<compile_context>
chip_gen: v6e
topology: v6e:2x2x1
jax: 0.10.0
libtpu: 0.0.40
codegen_flags: <defaults>
</compile_context>

<pallas_src>
import jax
import jax.numpy as jnp
import numpy as np
from jax.experimental import pallas as pl
from jax.experimental.pallas import tpu as pltpu

# Small, module-consistent config
B = 2          # batch
NUM_CAT = 3    # number of categorical features
NUM_CON = 5    # number of continuous features
D = 32         # args.tabular_embedding_dim
L = 4          # categorical length (same for every feature so torch.stack works)
N = 1 + NUM_CAT + NUM_CON  # CLS + features


def _fused_predictor_kernel(x_ref, w_ref, out_ref):
    # One MXU matmul: flattened tokens (+ ones column) @ block-diagonal weights
    # (+ folded bias row) -> a single lane-dense 2-D output slab.
    out_ref[...] = jnp.dot(
        x_ref[...], w_ref[...], preferred_element_type=jnp.float32
    ).astype(out_ref.dtype)


def _pack_weights(w_cat, b_cat, w_con, b_con, num_con):
    """Pack all params into one 2-D matrix for the fused matmul.

    Rows [i*D:(i+1)*D]            x cols [i*L:(i+1)*L]   = w_cat[i]   (D, L)
    Rows [(num_cat+n)*D : +D]     x col  [num_cat*L + n] = w_con[0]   (D,)
    Row  [-1] (driven by the appended ones column)       = concat(all biases)
    """
    num_cat, d_emb, l_cat = w_cat.shape
    out_dim = num_cat * l_cat + num_con
    k_dim = (num_cat + num_con) * d_emb + 1
    w = jnp.zeros((k_dim, out_dim), jnp.float32)
    for i in range(num_cat):
        w = w.at[i * d_emb:(i + 1) * d_emb, i * l_cat:(i + 1) * l_cat].set(w_cat[i])
    for n in range(num_con):
        r = (num_cat + n) * d_emb
        w = w.at[r:r + d_emb, num_cat * l_cat + n].set(w_con[0])
    bias_row = jnp.concatenate(
        [b_cat.reshape(-1), jnp.broadcast_to(b_con.reshape(-1), (num_con,))])
    w = w.at[-1, :].set(bias_row)
    return w


def tabular_predictor(x, w_cat, b_cat, w_con, b_con, *, batch_tile=256):
    """x: (B, N, D); w_cat: (NUM_CAT, D, L); b_cat: (NUM_CAT, L);
    w_con: (1, D); b_con: (1,).
    Returns (cat_out (B, NUM_CAT, L), con_out (B, NUM_CON, 1))."""
    bsz, n_tok, d_emb = x.shape
    num_cat, _, l_cat = w_cat.shape
    num_con = n_tok - 1 - num_cat
    n_feat = num_cat + num_con
    out_dim = num_cat * l_cat + num_con
    k_dim = n_feat * d_emb + 1

    # Pre-packed 2-D block-diagonal weight (biases folded into the last row).
    w_packed = _pack_weights(w_cat, b_cat, w_con, b_con, num_con)   # (k_dim, out_dim)

    # Drop the CLS token, flatten the feature tokens into lanes, and append a
    # ones column that picks up the folded bias row (layout plumbing stays in
    # the wrapper; the kernel sees a lane-dense 2-D operand).
    x_flat = x[:, 1:, :].reshape(bsz, n_feat * d_emb)
    x_aug = jnp.concatenate(
        [x_flat, jnp.ones((bsz, 1), x_flat.dtype)], axis=1)          # (bsz, k_dim)

    if bsz <= batch_tile:
        # Tiny batch: single gridless invocation, whole arrays resident in VMEM
        # (no 1-step pipeline prologue/epilogue).
        out = pl.pallas_call(
            _fused_predictor_kernel,
            out_shape=jax.ShapeDtypeStruct((bsz, out_dim), jnp.float32),
        )(x_aug, w_packed)
    else:
        # Real batches: tile the batch axis ("parallel" -> shards across
        # TensorCores on v7x); the packed weight stays resident across steps.
        bt = batch_tile
        bsz_pad = pl.cdiv(bsz, bt) * bt
        if bsz_pad != bsz:
            x_aug = jnp.pad(x_aug, ((0, bsz_pad - bsz), (0, 0)))
        out = pl.pallas_call(
            _fused_predictor_kernel,
            out_shape=jax.ShapeDtypeStruct((bsz_pad, out_dim), jnp.float32),
            grid=(bsz_pad // bt,),
            in_specs=[pl.BlockSpec((bt, k_dim), lambda i: (i, 0)),
                      pl.BlockSpec((k_dim, out_dim), lambda i: (0, 0))],
            out_specs=pl.BlockSpec((bt, out_dim), lambda i: (i, 0)),
            compiler_params=pltpu.CompilerParams(
                dimension_semantics=("parallel",)),
        )(x_aug, w_packed)
        out = out[:bsz]

    # Split the single lane-dense slab back into the torch outputs.
    cat_out = out[:, :num_cat * l_cat].reshape(bsz, num_cat, l_cat)
    con_out = out[:, num_cat * l_cat:].reshape(bsz, num_con, 1)
    return cat_out, con_out


def reference(x, w_cat, b_cat, w_con, b_con):
    """Pure-JAX reference of the torch forward (3-D path)."""
    num_cat = w_cat.shape[0]
    x_cat = x[:, 1:1 + num_cat, :]                          # (B, NUM_CAT, D)
    cat_ref = jnp.einsum("bid,idl->bil", x_cat, w_cat) + b_cat[None]
    x_con = x[:, 1 + num_cat:, :]                           # (B, NUM_CON, D)
    con_ref = jnp.einsum("bnd,d->bn", x_con, w_con[0])[..., None] + b_con[0]
    return cat_ref, con_ref


if __name__ == "__main__":
    key = jax.random.PRNGKey(0)
    k_x, k_wc, k_wr, k_bc, k_br, k_x2 = jax.random.split(key, 6)

    # Input tokens (output of the tabular transformer encoder)
    x = jax.random.normal(k_x, (B, N, D), dtype=jnp.float32)

    # Parameters like _init_weights: weight ~ N(0, 0.02). torch Linear weight
    # is (out, in); transpose to (in, out) for the kernel.  Biases are zero at
    # init in torch, but we use small non-zero ones so the folded-bias row is
    # actually exercised by the check.
    w_cat_torch = 0.02 * jax.random.normal(k_wc, (NUM_CAT, L, D), dtype=jnp.float32)
    w_cat = jnp.transpose(w_cat_torch, (0, 2, 1))            # (NUM_CAT, D, L)
    w_con = 0.02 * jax.random.normal(k_wr, (1, D), dtype=jnp.float32)  # (out=1, in=D)
    b_cat = 0.02 * jax.random.normal(k_bc, (NUM_CAT, L), dtype=jnp.float32)
    b_con = 0.02 * jax.random.normal(k_br, (1,), dtype=jnp.float32)

    # --- tiny batch: gridless fused-matmul path ---
    cat_out, con_out = tabular_predictor(x, w_cat, b_cat, w_con, b_con)
    jax.block_until_ready((cat_out, con_out))
    cat_ref, con_ref = reference(x, w_cat, b_cat, w_con, b_con)
    np.testing.assert_allclose(np.asarray(cat_out), np.asarray(cat_ref),
                               rtol=1e-5, atol=1e-5)
    np.testing.assert_allclose(np.asarray(con_out), np.asarray(con_ref),
                               rtol=1e-5, atol=1e-5)

    # --- larger batch: exercises the batch-tiled "parallel" grid path ---
    B2 = 300
    x2 = jax.random.normal(k_x2, (B2, N, D), dtype=jnp.float32)
    cat_out2, con_out2 = tabular_predictor(x2, w_cat, b_cat, w_con, b_con)
    jax.block_until_ready((cat_out2, con_out2))
    cat_ref2, con_ref2 = reference(x2, w_cat, b_cat, w_con, b_con)
    np.testing.assert_allclose(np.asarray(cat_out2), np.asarray(cat_ref2),
                               rtol=1e-5, atol=1e-5)
    np.testing.assert_allclose(np.asarray(con_out2), np.asarray(con_ref2),
                               rtol=1e-5, atol=1e-5)

    print("KERNEL_OK")
</pallas_src>

<mosaic_0001>
module attributes {stable_mosaic.version = 11 : i64} {
  func.func @_fused_predictor_kernel(%arg0: memref<2x257xf32, #tpu.memory_space<vmem>>, %arg1: memref<257x17xf32, #tpu.memory_space<vmem>>, %arg2: memref<2x17xf32, #tpu.memory_space<vmem>>) attributes {dimension_semantics = [], scalar_prefetch = 0 : i64, scratch_operands = 0 : i64, tpu.core_type = #tpu.core_type<tc>} {
    %c0 = arith.constant 0 : index
    %c0_0 = arith.constant 0 : index
    %0 = vector.load %arg0[%c0, %c0_0] : memref<2x257xf32, #tpu.memory_space<vmem>>, vector<2x257xf32>
    %c0_1 = arith.constant 0 : index
    %c0_2 = arith.constant 0 : index
    %1 = vector.load %arg1[%c0_1, %c0_2] : memref<257x17xf32, #tpu.memory_space<vmem>>, vector<257x17xf32>
    %cst = arith.constant dense<0.000000e+00> : vector<2x17xf32>
    %2 = tpu.matmul %0, %1, %cst {dimension_numbers = #tpu.dot_dimension_numbers<[1], [0], [0], [1], [0, 0, 1, 1], [], []>} : vector<2x257xf32>, vector<257x17xf32>, vector<2x17xf32> -> vector<2x17xf32>
    %c0_3 = arith.constant 0 : index
    %c0_4 = arith.constant 0 : index
    %3 = vector.load %arg2[%c0_3, %c0_4] : memref<2x17xf32, #tpu.memory_space<vmem>>, vector<2x17xf32>
    tpu.vector_store %arg2[%c0_3, %c0_4], %2 {strides = array<i32>} : memref<2x17xf32, #tpu.memory_space<vmem>>, vector<2x17xf32>,
    return
  }
}

</mosaic_0001>

<bundles_post_ra>
// kernel: tpu_custom_call.1
= control target key start
LH: loop header
LB: loop body
LE: loop exit
PB: predicated region body
PF: predicated region fallthrough
CT: control target
= control target key end

     0   :  { %v51_v3 = vlaneseq  ;;  %v299_v5 = vmov 1983009808   ;;  %v300_v7 = vmov 0.0   ;;  %vm301_vm0 = vmmov 0   ;;  %s423_s0 = inlined_call_operand.vmem [shape: f32[2,257], index: 0, kind: input, shape index: {}]   ;;  %s424_s1 = inlined_call_operand.vmem [shape: f32[257,17], index: 1, kind: input, shape index: {}]   ;;  %s425_s2 = inlined_call_operand.hbm [shape: f32[2,17], index: 2, kind: output, shape index: {}]  }
   0x1   :  { %v44_v0 = vld [vmem:[%s424_s1 + $0xf8] sm:$0xff]  ;;  %v43_v2 = vld [vmem:[%s424_s1 + $0xf0] sm:$0xff]  ;;  %v49_v6 = vunpack.c.l.s4 %v299_v5  ;;  %267 = vmatprep.subr.mxu1 %v300_v7  ;;  %v42_v8 = vld [vmem:[%s424_s1 + $0xe8] sm:$0xff]  ;;  %269 = vmatprep.mubr.msk.f32.mxu1 %vm301_vm0, %v300_v7  ;;  %vm68_vm1 = vcmask 1040384  }
   0x2   :  { %v28_v1 = vld [vmem:[%s424_s1 + $0x78] sm:$0xff]  ;;  %230 = vmatprep.subr.mxu0 %v44_v0  ;;  %v27_v4 = vld [vmem:[%s424_s1 + $0x70] sm:$0xff]  ;;  %v26_v9 = vld [vmem:[%s424_s1 + $0x68] sm:$0xff]  ;;  %v52_v11 = vshrl.u32 %v51_v3, 7 }
   0x3   :  { %231 = vmatpush3.msra.mxu0 %v28_v1  ;;  %v50_v10 = vunpack.c.0.s8 %v49_v6  ;;  %v41_v12 = vld [vmem:[%s424_s1 + $0xe0] sm:$0xff]  ;;  %v40_v14 = vld [vmem:[%s424_s1 + $0xd8] sm:$0xff]  ;;  %v39_v17 = vld [vmem:[%s424_s1 + $0xd0] sm:$0xff] }
   0x4   :  { %232 = vmatprep.subr.mxu0 %v43_v2  ;;  %v25_v13 = vld [vmem:[%s424_s1 + $0x60] sm:$0xff]  ;;  %v24_v15 = vld [vmem:[%s424_s1 + $0x58] sm:$0xff]  ;;  %v23_v18 = vld [vmem:[%s424_s1 + $0x50] sm:$0xff] }
   0x5   :  { %233 = vmatpush3.msra.mxu0 %v27_v4  ;;  %v53_v16 = vsub.s32 %v50_v10, %v52_v11  ;;  %v38_v19 = vld [vmem:[%s424_s1 + $0xc8] sm:$0xff]  ;;  %v12_v20 = vld [vmem:[%s423_s0] sm:$0x3f] }
   0x6   :  { %234 = vmatprep.subr.mxu0 %v42_v8  ;;  %v22_v21 = vld [vmem:[%s424_s1 + $0x48] sm:$0xff]  ;;  %v47_v22 = vcombine.high %v12_v20, %v12_v20  ;;  %v45_v24 = vld [vmem:[%s424_s1 + $0x100] sm:$0x1] }
   0x7   :  { %235 = vmatpush3.msra.mxu0 %v26_v9  ;;  %v54_v23 = vrot.slane %v12_v20, %v53_v16 }
   0x8   :  { %236 = vmatprep.subr.mxu0 %v41_v12 }
   0x9   :  { %237 = vmatpush3.msra.mxu0 %v25_v13 }
   0xa   :  { %238 = vmatprep.subr.mxu0 %v40_v14 }
   0xb   :  { %239 = vmatpush3.msra.mxu0 %v24_v15 }
   0xc   :  { %240 = vmatprep.subr.mxu0 %v39_v17 }
   0xd   :  { %7 = vsyncpa [#allocation3], 0  ;;  %241 = vmatpush3.msra.mxu0 %v23_v18  ;;  %v37_v25 = vld [vmem:[%s424_s1 + $0xc0] sm:$0xff]  ;;  %268 = vmatpush3.msk.msra.mxu1 %vm68_vm1, %v45_v24  ;;  %v61_v27 = vrot.slane %v47_v22, %v53_v16  ;;  %v62_v28 = vcombine.high %v54_v23, %v54_v23  ;;  %vm65_vm2 = vcmask 7168   ;;  %v36_v29 = vld [vmem:[%s424_s1 + $0xb8] sm:$0xff]  ;;  %s302_s19 = smov [#allocation2]  }
   0xe   :  { %242 = vmatprep.subr.mxu0 %v38_v19  ;;  %v21_v26 = vld [vmem:[%s424_s1 + $0x40] sm:$0xff]  ;;  %v20_v30 = vld [vmem:[%s424_s1 + $0x38] sm:$0xff]  ;;  %v35_v31 = vld [vmem:[%s424_s1 + $0xb0] sm:$0xff]  ;;  %s220_s20 = sshll.u32 %s302_s19, 4  ;;  %vm212_vm3 = vcmask 132096   ;;  %s221_s20 = int_to_ptr.vmem [resolvable:$true] %s220_s20 }
   0xf   :  { %243 = vmatpush3.msra.mxu0 %v22_v21  ;;  %136 = vmatprep.mubr.f32.mxu0 %v62_v28  ;;  %v19_v32 = vld [vmem:[%s424_s1 + $0x30] sm:$0xff]  ;;  %v34_v33 = vld [vmem:[%s424_s1 + $0xa8] sm:$0xff]  ;;  %v33_v35 = vld [vmem:[%s424_s1 + $0xa0] sm:$0xff]  ;;  %s277_s21 = scalar_lea.vmem %s221_s20, 32  ;;  %p282_p1 = scmp.lt.s32.totalorder %s221_s20, %s221_s20 }
  0x10   :  { %244 = vmatprep.subr.mxu0 %v37_v25  ;;  %270 = vmatmul.mubr.msk.f32.vlgmr.msra.gmra.mxu1 %vm65_vm2, %v61_v27  ;;  %v18_v34 = vld [vmem:[%s424_s1 + $0x28] sm:$0xff]  ;;  %v17_v36 = vld [vmem:[%s424_s1 + $0x20] sm:$0xff]  ;;  %v32_v37 = vld [vmem:[%s424_s1 + $0x98] sm:$0xff]  ;;  %p278_p0 = scmp.ne.s32.totalorder %s221_s20, %s277_s21  ;;  %p283_p2 = scmp.lt.s32.totalorder %s277_s21, %s277_s21 }
  0x11   :  { %245 = vmatpush3.msra.mxu0 %v21_v26  ;;  %v16_v38 = vld [vmem:[%s424_s1 + $0x18] sm:$0xff]  ;;  %v31_v39 = vld [vmem:[%s424_s1 + $0x90] sm:$0xff]  ;;  %v30_v41 = vld [vmem:[%s424_s1 + $0x88] sm:$0xff] }
  0x12   :  { %246 = vmatprep.subr.mxu0 %v36_v29  ;;  %v15_v40 = vld [vmem:[%s424_s1 + $0x10] sm:$0xff]  ;;  %v14_v42 = vld [vmem:[%s424_s1 + $0x8] sm:$0xff]  ;;  %v29_v43 = vld [vmem:[%s424_s1 + $0x80] sm:$0xff]  ;;  %p284_p3 = por %p283_p2, %p282_p1 }
  0x13   :  { %247 = vmatpush3.msra.mxu0 %v20_v30  ;;  %v13_v44 = vld [vmem:[%s424_s1] sm:$0xff] }
  0x14   :  { %248 = vmatprep.subr.mxu0 %v35_v31  ;;  %p285_p4 = pnand %p284_p3, %p278_p0 }
  0x15   :  { %249 = vmatpush3.msra.mxu0 %v19_v32 }
  0x16   :  { %250 = vmatprep.subr.mxu0 %v34_v33 }
  0x17   :  { %251 = vmatpush3.msra.mxu0 %v18_v34 }
  0x18   :  { %252 = vmatprep.subr.mxu0 %v33_v35 }
  0x19   :  { %253 = vmatpush3.msra.mxu0 %v17_v36 }
  0x1a   :  { %254 = vmatprep.subr.mxu0 %v32_v37 }
  0x1b   :  { %255 = vmatpush3.msra.mxu0 %v16_v38 }
  0x1c   :  { %256 = vmatprep.subr.mxu0 %v31_v39 }
  0x1d   :  { %257 = vmatpush3.msra.mxu0 %v15_v40 }
  0x1e   :  { %258 = vmatprep.subr.mxu0 %v30_v41 }
  0x1f   :  { %259 = vmatpush3.msra.mxu0 %v14_v42 }
  0x20   :  { %260 = vmatprep.subr.mxu0 %v29_v43 }
  0x21   :  { %261 = vmatpush3.msra.mxu0 %v13_v44 }
  0x22   :  { %137 = vmatmul.mubr.f32.vlgmr.msra.gmra.mxu0 %v54_v23 }
  0xd0   :  { %v208_v45 = vpop.f32.mrf.mxu1 }
  0xd2   :  { %v271_v46 = vpop.f32.mrf.mxu1 }
  0xe2   :  { %v262_v47 = vpop.f32.mrf.mxu0 }
  0xe4   :  { %v263_v48 = vpop.f32.mrf.mxu0 }
  0xe5   :  { %v264_v49 = vadd.f32 %v263_v48, %v262_v47 }
  0xe7   :  { %v209_v50 = vadd.f32 %v264_v49, %v208_v45 }
  0xe9   :  { %213 = vst.msk [vmem:[#allocation2] sm:$0x3] %vm212_vm3, %v209_v50 }
  0xea   :  { %288 = shalt.err (!%p285_p4)
}
  0xeb   :  { %223 = dma.vmem_to_hbm [thread:$0]  %s221_s20, 32, %s425_s2, [#allocation3]  }
  0xec   :  { %297 = dma.done.wait [#allocation3], 32  }
  0xed   :  { %298 = vsyncadd [#allocation3], 4294967264 }
  0xee   :  { %227 = vsyncpa [#allocation3], 1 }

</bundles_post_ra>
